<compile_context>
chip_gen: v5e
topology: v5e:2x2
jax: 0.10.0
libtpu: 0.0.40
codegen_flags: <defaults>
</compile_context>

<pallas_src>
import functools

import jax
import jax.numpy as jnp
from jax.experimental import pallas as pl
from jax.experimental.pallas import tpu as pltpu


def _round_up(x, m):
    return ((x + m - 1) // m) * m


# ----------------------------------------------------------------------------
# Pallas kernel: one (tm, D) row-tile of the output, accumulated over d_ff tiles.
# Grid = (row tiles ["parallel"], d_ff tiles ["arbitrary", reduction, last]).
# ----------------------------------------------------------------------------
def _ffn_kernel(x_ref, w1_ref, w2_ref, o_ref, *scratch, activation, compute_dtype):
    # If the output is f32 we accumulate straight into o_ref (resident across the
    # f axis); otherwise a dedicated f32 VMEM scratch accumulator is supplied.
    acc_ref = scratch[0] if scratch else o_ref
    f = pl.program_id(1)

    @pl.when(f == 0)
    def _init():
        acc_ref[...] = jnp.zeros_like(acc_ref)

    # linear_1 chunk: (tm, D) @ (D, tf) -> (tm, tf); bf16 MXU operands, f32 accumulation.
    h = jnp.dot(
        x_ref[...].astype(compute_dtype),
        w1_ref[...].astype(compute_dtype),
        preferred_element_type=jnp.float32,
    )

    # activation in f32 on the VPU/EUP
    if activation == "relu":
        h = jnp.maximum(h, 0.0)
    elif activation == "gelu":
        h = jax.nn.gelu(h, approximate=False)  # exact erf, matches torch.nn.GELU
    else:
        # Matches the PyTorch module: any other string leaves self.act undefined.
        raise ValueError(f"unsupported activation: {activation!r}")

    # TODO(synk): dropout is an inference-mode identity here (eval semantics).

    # linear_2 partial product, accumulated across the d_ff grid axis:
    # (tm, tf) @ (tf, D) -> (tm, D)
    acc_ref[...] += jnp.dot(
        h.astype(compute_dtype),
        w2_ref[...].astype(compute_dtype),
        preferred_element_type=jnp.float32,
    )

    if scratch:
        @pl.when(f == pl.num_programs(1) - 1)
        def _finalize():
            o_ref[...] = acc_ref[...].astype(o_ref.dtype)


# ----------------------------------------------------------------------------
# Per-generation VMEM budget + tile selection.
# ----------------------------------------------------------------------------
def _vmem_budget_and_tm_candidates():
    kind = ""
    try:
        kind = jax.devices()[0].device_kind.lower()
    except Exception:
        pass

    if "v7" in kind:
        budget = 48 * 1024 * 1024          # 64 MiB physical per TC on v7x
        tm_cands = (512, 256, 128)
    elif "v5" in kind:
        budget = 100 * 1024 * 1024         # 128 MiB physical; ridge ~240 FLOPs/B
        tm_cands = (512, 384, 256, 128)
    else:                                   # v6e and unknown
        budget = 100 * 1024 * 1024         # 128 MiB physical; ridge ~650 FLOPs/B
        tm_cands = (1024, 768, 512, 256, 128)

    try:
        cap = getattr(pltpu.get_tpu_info(), "vmem_capacity_bytes", None)
        if cap:
            budget = min(budget, int(0.75 * cap))
    except Exception:
        pass
    return budget, tm_cands


def _select_tiles(M, D, d_ff, x_bytes, w_bytes, out_bytes, use_scratch,
                  tm_cands, budget):
    # Full (padded) d_ff first -> weights stay resident across all row tiles when they fit.
    d_ff_full = _round_up(d_ff, 128)
    tf_cands = list(dict.fromkeys(
        [d_ff_full] + [t for t in (1024, 512, 256) if t < d_ff_full]))

    tm_c = [t for t in tm_cands if t <= M] or [_round_up(M, 8)]

    acc_bytes = 4 if use_scratch else 0
    fit = int(0.85 * budget)  # headroom for Mosaic-internal scratch

    for tm in tm_c:
        for tf in tf_cands:
            fp = (2 * tm * D * x_bytes        # x block (double-buffered)
                  + 2 * D * tf * w_bytes      # W1 block
                  + 2 * tf * D * w_bytes      # W2 block
                  + 2 * tm * D * out_bytes    # output block
                  + tm * D * acc_bytes)       # f32 scratch accumulator (if any)
            if fp <= fit:
                return tm, tf
    return tm_c[-1], tf_cands[-1]


# ----------------------------------------------------------------------------
# Wrapper
# ----------------------------------------------------------------------------
def feed_forward_pallas(x, w1, w2, *, activation="relu", compute_dtype=jnp.bfloat16):
    """x: (B, S, D); w1: (D, d_ff) == linear_1.weight.T; w2: (d_ff, D) == linear_2.weight.T.

    Weights are expected to be stored in bf16 upstream (no per-call wrapper casts).
    """
    B, S, D = x.shape
    d_ff = w1.shape[1]
    assert w1.shape == (D, d_ff) and w2.shape == (d_ff, D)

    M = B * S
    xm = x.reshape(M, D)

    out_dtype = x.dtype
    use_scratch = out_dtype != jnp.float32   # f32 output -> accumulate directly into o_ref

    budget, tm_cands = _vmem_budget_and_tm_candidates()
    tm, tf = _select_tiles(
        M, D, d_ff,
        x_bytes=x.dtype.itemsize,
        w_bytes=w1.dtype.itemsize,
        out_bytes=jnp.dtype(out_dtype).itemsize,
        use_scratch=use_scratch,
        tm_cands=tm_cands,
        budget=budget,
    )

    M_pad = _round_up(M, tm)
    # Make sure the "parallel" row axis has >= 2 steps so it can be split across the
    # two TensorCores on v7x; costs one extra (cheap) grid step elsewhere.
    if M_pad // tm == 1 and tm >= 16:
        tm = _round_up(tm // 2, 8)
        M_pad = _round_up(M, tm)

    d_ff_pad = _round_up(d_ff, tf)

    if M_pad != M:
        xm = jnp.pad(xm, ((0, M_pad - M), (0, 0)))
    w1p, w2p = w1, w2
    if d_ff_pad != d_ff:
        # Zero-padded hidden units contribute exactly zero (relu(0)=gelu(0)=0).
        w1p = jnp.pad(w1, ((0, 0), (0, d_ff_pad - d_ff)))
        w2p = jnp.pad(w2, ((0, d_ff_pad - d_ff), (0, 0)))

    grid = (M_pad // tm, d_ff_pad // tf)

    kernel = functools.partial(_ffn_kernel, activation=activation,
                               compute_dtype=compute_dtype)
    scratch_shapes = [pltpu.VMEM((tm, D), jnp.float32)] if use_scratch else []

    out = pl.pallas_call(
        kernel,
        out_shape=jax.ShapeDtypeStruct((M_pad, D), out_dtype),
        grid=grid,
        in_specs=[
            pl.BlockSpec((tm, D), lambda i, f: (i, 0)),   # x row tile (invariant in f)
            pl.BlockSpec((D, tf), lambda i, f: (0, f)),   # W1 column tile
            pl.BlockSpec((tf, D), lambda i, f: (f, 0)),   # W2 row tile
        ],
        out_specs=pl.BlockSpec((tm, D), lambda i, f: (i, 0)),
        scratch_shapes=scratch_shapes,
        compiler_params=pltpu.CompilerParams(
            dimension_semantics=("parallel", "arbitrary"),
            vmem_limit_bytes=int(budget),
        ),
    )(xm, w1p, w2p)

    if M_pad != M:
        out = out[:M]
    return out.reshape(B, S, D)


# ----------------------------------------------------------------------------
# Pure-JAX reference (same bf16 matmul casts, f32 accumulation) for correctness.
# ----------------------------------------------------------------------------
def feed_forward_ref(x, w1, w2, *, activation="relu", compute_dtype=jnp.bfloat16):
    B, S, D = x.shape
    xm = x.reshape(-1, D).astype(compute_dtype)
    h = jnp.dot(xm, w1.astype(compute_dtype), preferred_element_type=jnp.float32)
    if activation == "relu":
        h = jnp.maximum(h, 0.0)
    elif activation == "gelu":
        h = jax.nn.gelu(h, approximate=False)
    out = jnp.dot(h.astype(compute_dtype), w2.astype(compute_dtype),
                  preferred_element_type=jnp.float32)
    return out.reshape(B, S, D).astype(x.dtype)


if __name__ == "__main__":
    # Small deterministic config consistent with the module.
    B, S, D, D_FF = 2, 16, 32, 128
    ACT = "relu"  # module default string 'RELU' would leave self.act undefined in PyTorch

    root = jax.random.PRNGKey(0)
    kx, k1, k2 = jax.random.split(root, 3)

    x = jax.random.normal(kx, (B, S, D), dtype=jnp.float32)
    # nn.Linear(d_model, d_ff, bias=False): weight (d_ff, D); we pass W^T = (D, d_ff).
    # Weights are stored bf16 upstream (cast once here, not on every call).
    w1 = ((jax.random.normal(k1, (D_FF, D), dtype=jnp.float32) / jnp.sqrt(D)).T
          ).astype(jnp.bfloat16)
    # nn.Linear(d_ff, d_model, bias=False): weight (D, d_ff); we pass W^T = (d_ff, D).
    w2 = ((jax.random.normal(k2, (D, D_FF), dtype=jnp.float32) / jnp.sqrt(D_FF)).T
          ).astype(jnp.bfloat16)

    out = feed_forward_pallas(x, w1, w2, activation=ACT)
    out = jax.block_until_ready(out)

    ref = feed_forward_ref(x, w1, w2, activation=ACT)
    assert out.shape == (B, S, D)
    assert out.dtype == x.dtype
    assert jnp.allclose(out, ref, atol=2e-2, rtol=2e-2), "Pallas output mismatch vs reference"

    print("KERNEL_OK")
</pallas_src>

<mosaic_0001>
module attributes {stable_mosaic.version = 11 : i64} {
  func.func @_ffn_kernel(%arg0: i32, %arg1: i32, %arg2: memref<16x32xf32, #tpu.memory_space<vmem>>, %arg3: memref<32x128xbf16, #tpu.memory_space<vmem>>, %arg4: memref<128x32xbf16, #tpu.memory_space<vmem>>, %arg5: memref<16x32xf32, #tpu.memory_space<vmem>>) attributes {dimension_semantics = [#tpu.dimension_semantics<parallel>, #tpu.dimension_semantics<arbitrary>], iteration_bounds = array<i64: 2, 1>, scalar_prefetch = 0 : i64, scratch_operands = 0 : i64, tpu.core_type = #tpu.core_type<tc>, window_params = [{transform_indices = @transform_0, window_bounds = array<i64: 16, 32>}, {transform_indices = @transform_1, window_bounds = array<i64: 32, 128>}, {transform_indices = @transform_2, window_bounds = array<i64: 128, 32>}, {transform_indices = @transform_3, window_bounds = array<i64: 16, 32>}]} {
    %c0_i32 = arith.constant 0 : i32
    %0 = arith.cmpi eq, %arg1, %c0_i32 : i32
    %1 = arith.extui %0 : i1 to i32
    %c0_i32_0 = arith.constant 0 : i32
    %2 = arith.cmpi ne, %1, %c0_i32_0 : i32
    scf.if %2 {
      %cst_12 = arith.constant 0.000000e+00 : f32
      %15 = vector.broadcast %cst_12 : f32 to vector<16x32xf32>
      %c0_13 = arith.constant 0 : index
      %c0_14 = arith.constant 0 : index
      %16 = vector.load %arg5[%c0_13, %c0_14] : memref<16x32xf32, #tpu.memory_space<vmem>>, vector<16x32xf32>
      tpu.vector_store %arg5[%c0_13, %c0_14], %15 {strides = array<i32>} : memref<16x32xf32, #tpu.memory_space<vmem>>, vector<16x32xf32>,
    } else {
    }
    %c0 = arith.constant 0 : index
    %c0_1 = arith.constant 0 : index
    %3 = vector.load %arg2[%c0, %c0_1] : memref<16x32xf32, #tpu.memory_space<vmem>>, vector<16x32xf32>
    %4 = arith.truncf %3 : vector<16x32xf32> to vector<16x32xbf16>
    %c0_2 = arith.constant 0 : index
    %c0_3 = arith.constant 0 : index
    %5 = vector.load %arg3[%c0_2, %c0_3] : memref<32x128xbf16, #tpu.memory_space<vmem>>, vector<32x128xbf16>
    %cst = arith.constant dense<0.000000e+00> : vector<16x128xf32>
    %6 = tpu.matmul %4, %5, %cst {dimension_numbers = #tpu.dot_dimension_numbers<[1], [0], [0], [1], [0, 0, 1, 1], [], []>} : vector<16x32xbf16>, vector<32x128xbf16>, vector<16x128xf32> -> vector<16x128xf32>
    %cst_4 = arith.constant 0.000000e+00 : f32
    %7 = vector.broadcast %cst_4 : f32 to vector<16x128xf32>
    %8 = arith.maximumf %6, %7 : vector<16x128xf32>
    %c0_5 = arith.constant 0 : index
    %c0_6 = arith.constant 0 : index
    %9 = vector.load %arg5[%c0_5, %c0_6] : memref<16x32xf32, #tpu.memory_space<vmem>>, vector<16x32xf32>
    %10 = arith.truncf %8 : vector<16x128xf32> to vector<16x128xbf16>
    %c0_7 = arith.constant 0 : index
    %c0_8 = arith.constant 0 : index
    %11 = vector.load %arg4[%c0_7, %c0_8] : memref<128x32xbf16, #tpu.memory_space<vmem>>, vector<128x32xbf16>
    %cst_9 = arith.constant dense<0.000000e+00> : vector<16x32xf32>
    %12 = tpu.matmul %10, %11, %cst_9 {dimension_numbers = #tpu.dot_dimension_numbers<[1], [0], [0], [1], [0, 0, 1, 1], [], []>} : vector<16x128xbf16>, vector<128x32xbf16>, vector<16x32xf32> -> vector<16x32xf32>
    %13 = arith.addf %9, %12 : vector<16x32xf32>
    %c0_10 = arith.constant 0 : index
    %c0_11 = arith.constant 0 : index
    %14 = vector.load %arg5[%c0_10, %c0_11] : memref<16x32xf32, #tpu.memory_space<vmem>>, vector<16x32xf32>
    tpu.vector_store %arg5[%c0_10, %c0_11], %13 {strides = array<i32>} : memref<16x32xf32, #tpu.memory_space<vmem>>, vector<16x32xf32>,
    return
  }
  func.func @transform_0(%arg0: i32, %arg1: i32) -> (i32, i32) {
    %c0_i32 = arith.constant 0 : i32
    %c0_i32_0 = arith.constant 0 : i32
    return %arg0, %c0_i32 : i32, i32
  }
  func.func @transform_1(%arg0: i32, %arg1: i32) -> (i32, i32) {
    %c0_i32 = arith.constant 0 : i32
    %c0_i32_0 = arith.constant 0 : i32
    return %c0_i32, %arg1 : i32, i32
  }
  func.func @transform_2(%arg0: i32, %arg1: i32) -> (i32, i32) {
    %c0_i32 = arith.constant 0 : i32
    %c0_i32_0 = arith.constant 0 : i32
    return %arg1, %c0_i32 : i32, i32
  }
  func.func @transform_3(%arg0: i32, %arg1: i32) -> (i32, i32) {
    %c0_i32 = arith.constant 0 : i32
    %c0_i32_0 = arith.constant 0 : i32
    return %arg0, %c0_i32 : i32, i32
  }
}

</mosaic_0001>

<bundles_post_ra>
// kernel: tpu_custom_call.1
= control target key start
LH: loop header
LB: loop body
LE: loop exit
PB: predicated region body
PF: predicated region fallthrough
CT: control target
= control target key end

     0   :  { %8 = vsyncpa [#allocation3], 0  ;;  %s843_s0 = inlined_call_operand.vmem [shape: f32[32,32], index: 0, kind: input, shape index: {}]   ;;  %s844_s1 = inlined_call_operand.vmem [shape: bf16[32,128], index: 1, kind: input, shape index: {}]   ;;  %s845_s2 = inlined_call_operand.vmem [shape: bf16[128,32], index: 2, kind: input, shape index: {}]   ;;  %s846_s3 = inlined_call_operand.hbm [shape: f32[32,32], index: 3, kind: output, shape index: {}]  }
   0x1   :  { %10 = vsyncpa [#allocation3 + $0x1], 0  ;;  %s699_s12 = smov 0   ;;  %s701_s13 = smov 0  }
   0x2   :  { %s703_s14 = smov 0   ;;  %s705_s15 = smov 0  }
   0x3   :  { %s707_s16 = smov 0   ;;  %s709_s17 = smov 0  }
   0x4 LB: > { %s471_s18 = sadd.s32 4294967295, %s674_s17   ;;  %s472_s19 = sadd.s32 4294967294, %s674_s17   ;;  %s674_s17 = sphi %s709_s17, %s16_s17   ;;  %s670_s16 = sphi %s707_s16, %s853_s16   ;;  %s666_s15 = sphi %s705_s15, %s852_s15   ;;  %s662_s14 = sphi %s703_s14, %s851_s14   ;;  %s658_s13 = sphi %s701_s13, %s850_s13   ;;  %s654_s12 = sphi %s699_s12, %s849_s12  }
   0x5   : > { %s28_s20 = sadd.s32 1, %s670_s16  ;;  %s113_s21 = sadd.s32 1, %s662_s14 }
   0x6   : > { %p30_p0 = scmp.ge.s32.totalorder %s28_s20, 2  ;;  %p123_p1 = scmp.ne.s32.totalorder %s662_s14, %s658_s13 }
   0x7   : > { %p124_p2 = scmp.eq.s32.totalorder %s471_s18, 1  ;;  %p129_p3 = scmp.ne.s32.totalorder %s658_s13, %s654_s12 }
   0x8   : > { %s855_s20 = smov (%p30_p0, %s28_s20), 0  ;;  %p130_p5 = scmp.eq.s32.totalorder %s472_s19, 1 }
   0x9   : > { %p739_p4 = por %p124_p2, %p123_p1  ;;  %s110_s23 = ssub.s32 %s670_s16, %s855_s20 }
   0xa   : > { %p477_p6 = scmp.ge.s32.totalorder %s674_s17, 1  ;;  %p111_p7 = scmp.eq.s32.totalorder %s110_s23, 0 }
   0xb   : > { %p746_p8 = por %p130_p5, %p129_p3  ;;  %p173_p9 = scmp.lt.s32.totalorder %s674_s17, 3 }
   0xc   : > { %s752_s25 = scalar_select %p111_p7, %s662_s14, %s113_s21  }
   0xd   : > { %p174_p10 = pnand %p477_p6, %p173_p9 }
   0xe   : > { %s203_s28 = sand.u32 (!%p174_p10), 1, %s658_s13   ;;  %s479_s29 = sshll.u32 (!%p174_p10), %s666_s15, 1 }
   0xf   : > { %177 = sbr.rel (%p174_p10) target bundleno = 306 (0x132), region = 32  ;;  %s478_s30 = sshll.u32 (!%p174_p10), %s203_s28, 4 }
  0x10   : > { %p207_p11 = scmp.lt.s32.totalorder (!%p174_p10), %s479_s29, 3  ;;  %s767_s8 = scalar_lea.vmem (!%p174_p10), [#allocation2], %s478_s30 }
  0x11   : > { %s537_s18 = sshll.u32 (!%p174_p10), %s666_s15, 4  ;;  %s368_s26 = sshll.u32 (!%p174_p10), %s767_s8, 4  ;;  %s369_s26 = int_to_ptr.vmem [resolvable:$true] %s368_s26 }
  0x12   : > { %s367_s23 = scalar_lea.hbm (!%p174_p10), %s846_s3, %s537_s18  ;;  %s356_s15 = scalar_lea.sflag (!%p174_p10), [#allocation3], %s203_s28 }
  0x13   : > { %s370_s27 = sshll.u32 (!%p174_p10), %s367_s23, 4  ;;  %s616_s6 = scalar_lea.hbm (!%p174_p10), %s846_s3, 32  ;;  %s371_s27 = int_to_ptr.hbm [resolvable:$true] %s370_s27 }
  0x14   : > { %v528_v0 = vld [vmem:[%s844_s1 + $0x8] sm:$0xff]  ;;  %v536_v1 = vld [vmem:[%s845_s2 + $0x38] sm:$0xff]  ;;  %v527_v2 = vld [vmem:[%s844_s1] sm:$0xff]  ;;  %vm228_vm0 = vcmask 261120   ;;  %s857_s29 = smov (!%p207_p11, %s479_s29), 3  ;;  %v676_v3 = vmov 0.0  }
  0x15   : > { %260 = vmatpush.bf16.msra.mxu0 %v528_v0  ;;  %229 = vst.msk [vmem:[%s767_s8] sm:$0xff] %vm228_vm0, %v676_v3  ;;  %337 = vmatpush.bf16.msra.mxu1 %v536_v1  ;;  %v535_v4 = vld [vmem:[%s845_s2 + $0x30] sm:$0xff]  ;;  %s480_s11 = sshll.u32 %s857_s29, 3  ;;  %v534_v7 = vld [vmem:[%s845_s2 + $0x28] sm:$0xff]  ;;  %v533_v9 = vld [vmem:[%s845_s2 + $0x20] sm:$0xff]  ;;  %s610_s30 = sshra.s32 %s371_s27, 4  ;;  %s611_s30 = int_to_ptr.hbm [resolvable:$true] %s610_s30 }
  0x16   : > { %230 = vst.msk [vmem:[%s767_s8 + $0x8] sm:$0xff] %vm228_vm0, %v676_v3  ;;  %s210_s21 = scalar_lea.vmem %s843_s0, %s480_s11  ;;  %v532_v10 = vld [vmem:[%s845_s2 + $0x18] sm:$0xff]  ;;  %v531_v11 = vld [vmem:[%s845_s2 + $0x10] sm:$0xff]  ;;  %v530_v12 = vld [vmem:[%s845_s2 + $0x8] sm:$0xff]  ;;  %s612_s29 = scalar_lea.hbm %s611_s30, 16 }
  0x17   : > { %v231_v5 = vld [vmem:[%s210_s21] sm:$0xff]  ;;  %v232_v6 = vld [vmem:[%s210_s21 + $0x8] sm:$0xff]  ;;  %p613_p12 = scmp.ne.s32.totalorder %s611_s30, %s612_s29  ;;  %p617_p1 = scmp.lt.s32.totalorder %s611_s30, %s846_s3 }
  0x18   : > { %v233_v8 = vpack.c.bf16 %v232_v6, %v231_v5  ;;  %v529_v13 = vld [vmem:[%s845_s2] sm:$0xff]  ;;  %p618_p2 = scmp.lt.s32.totalorder %s616_s6, %s612_s29 }
  0x19   : > { %261 = vmatpush.bf16.msra.mxu0 %v527_v2  ;;  %338 = vmatpush.bf16.msra.mxu1 %v535_v4  ;;  %p614_p13 = pnand %p613_p12, %p739_p4 }
  0x1a   : > { %p619_p3 = por %p618_p2, %p617_p1 }
  0x1b   : > { %p615_p0 = pneg %p614_p13 }
  0x1c   : > { %489 = vmatmul.msk.bf16.vlgmr.msra.gmra.mxu0 %vm228_vm0, %v233_v8  ;;  %v270_v19 = vld [vmem:[%s767_s8] sm:$0xff] }
  0x1d   : > { %339 = vmatpush.bf16.msra.mxu1 %v534_v7  ;;  %v271_v22 = vld [vmem:[%s767_s8 + $0x8] sm:$0xff]  ;;  %p620_p5 = pnand %p619_p3, %p615_p0 }
  0x21   : > { %340 = vmatpush.bf16.msra.mxu1 %v533_v9 }
  0x25   : > { %341 = vmatpush.bf16.msra.mxu1 %v532_v10 }
  0x29   : > { %342 = vmatpush.bf16.msra.mxu1 %v531_v11 }
  0x2d   : > { %343 = vmatpush.bf16.msra.mxu1 %v530_v12 }
  0x31   : > { %344 = vmatpush.bf16.msra.mxu1 %v529_v13 }
  0x99   : > { %v263_v14 = vpop.f32.mrf.mxu0 }
  0x9a   : > { %v268_v16 = vmax.f32 %v263_v14, 0.0 }
  0xa1   : > { %v265_v15 = vpop.f32.mrf.mxu0 }
  0xa2   : > { %v269_v17 = vmax.f32 %v265_v15, 0.0 }
  0xa4   : > { %v272_v18 = vpack.c.bf16 %v269_v17, %v268_v16 }
  0xa6   : > { %345 = vmatmul.bf16.vlgmr.msra.gmra.mxu1 %v272_v18 }
 0x123   : > { %v346_v20 = vpop.f32.mrf.mxu1 }
 0x124   : > { %v351_v21 = vadd.f32 %v346_v20, %v270_v19 }
 0x126   : > { %353 = vst.msk [vmem:[%s767_s8] sm:$0xff] %vm228_vm0, %v351_v21 }
 0x12b   : > { %v348_v23 = vpop.f32.mrf.mxu1 }
 0x12c   : > { %v352_v24 = vadd.f32 %v348_v23, %v271_v22 }
 0x12e   : > { %354 = vst.msk [vmem:[%s767_s8 + $0x8] sm:$0xff] %vm228_vm0, %v352_v24 }
 0x12f   : > { %623 = shalt.err (!%p620_p5)
}
 0x130   : > { %s677_s28 = smov 128   ;;  %s678_s8 = smov 8  }
 0x131   : > { %538 = dma.vmem_to_hbm [thread:$0]  (%p739_p4), %s369_s26, 256, %s371_s27, %s356_s15, %s677_s28, %s677_s28, %s678_s8  }
 0x132 PF: > { %p544_p6 = scmp.ge.s32.totalorder %s674_s17, 2  ;;  %s385_s10 = sand.u32 1, %s654_s12  }
 0x133   : > { %s386_s11 = scalar_lea.sflag [#allocation3], %s385_s10 }
 0x134   : > { %p541_p7 = pnand %p544_p6, %p746_p8 }
 0x136   : > { %p542_p9 = pneg %p541_p7 }
 0x138   : > { %649 = dma.done.wait (%p542_p9), %s386_s11, 256  }
 0x139   : > { %651 = vsyncadd (%p542_p9), %s386_s11, 4294967040  ;;  %s16_s17 = sadd.s32 1, %s674_s17   ;;  %s849_s12 = smov %s658_s13 }
 0x13a   : > { %p13_p10 = scmp.ge.s32.totalorder %s16_s17, 4   ;;  %s850_s13 = smov %s662_s14 }
 0x13b   : > { %s851_s14 = smov %s752_s25  ;;  %s852_s15 = smov %s670_s16 }
 0x13c   : > { %s853_s16 = smov %s855_s20  ;;  %15 = sbr.rel (!%p13_p10) target bundleno = 4 (0x4), region = 77 }
 0x141   :  { %392 = vsyncpa [#allocation3], 1 }
 0x142   :  { %394 = vsyncpa [#allocation3 + $0x1], 1 }

</bundles_post_ra>
